<compile_context>
chip_gen: v6e
topology: v6e:2x2x1
jax: 0.10.0
libtpu: 0.0.40
codegen_flags: <defaults>
</compile_context>

<pallas_src>
import jax
import jax.numpy as jnp
import numpy as np
from jax.experimental import pallas as pl
from jax.experimental.pallas import tpu as pltpu


# ----------------------------- fused MLP kernel -------------------------------
def _reward_predictor_kernel(x_ref, w1_ref, b1_ref, w2_ref, b2_ref,
                             w3_ref, b3_ref, o_ref):
    # Contract activation dim 1 with weight dim 1 (PyTorch (out, in) layout),
    # i.e. x @ w.T, without materializing a transpose.
    dn = (((1,), (1,)), ((), ()))

    x = x_ref[...]                                                # (bn, 256)

    h = jax.lax.dot_general(x, w1_ref[...], dn,
                            preferred_element_type=jnp.float32)   # (bn, 128)
    h = jnp.maximum(h + b1_ref[...], 0.0)                         # ReLU

    h = jax.lax.dot_general(h, w2_ref[...], dn,
                            preferred_element_type=jnp.float32)   # (bn, 64)
    h = jnp.maximum(h + b2_ref[...], 0.0)                         # ReLU

    # fc3: single output unit -> lane-dense multiply + cross-lane reduce.
    o_ref[...] = jnp.sum(h * w3_ref[...], axis=-1, keepdims=True) + b3_ref[...]


def reward_predictor_forward(x, params, *, block_n=256):
    n, d = x.shape
    bn = n if n <= block_n else block_n          # collapse grid for tiny batches

    w1 = params["w1"]
    b1 = params["b1"].reshape(1, -1)
    w2 = params["w2"]
    b2 = params["b2"].reshape(1, -1)
    w3 = params["w3"]
    b3 = params["b3"].reshape(1, -1)

    def resident(a):
        # Same block index every grid step -> stays resident in VMEM.
        return pl.BlockSpec(a.shape, lambda i: (0, 0))

    return pl.pallas_call(
        _reward_predictor_kernel,
        out_shape=jax.ShapeDtypeStruct((n, 1), jnp.float32),
        grid=(pl.cdiv(n, bn),),
        in_specs=[
            pl.BlockSpec((bn, d), lambda i: (i, 0)),   # activation tile (pipelined)
            resident(w1), resident(b1),
            resident(w2), resident(b2),
            resident(w3), resident(b3),
        ],
        out_specs=pl.BlockSpec((bn, 1), lambda i: (i, 0)),
        compiler_params=pltpu.CompilerParams(
            dimension_semantics=("parallel",)),
    )(x, w1, b1, w2, b2, w3, b3)


# ----------------------------- pure-JAX reference ------------------------------
def reference_forward(x, params):
    h = jax.nn.relu(x @ params["w1"].T + params["b1"])
    h = jax.nn.relu(h @ params["w2"].T + params["b2"])
    return h @ params["w3"].T + params["b3"]


if __name__ == "__main__":
    key = jax.random.PRNGKey(0)
    kx, k1, k2, k3, k4, k5, k6, kx2 = jax.random.split(key, 8)

    params = {
        "w1": jax.random.normal(k1, (128, 256), jnp.float32) * (1.0 / np.sqrt(256.0)),
        "b1": jax.random.normal(k2, (128,), jnp.float32) * 0.1,
        "w2": jax.random.normal(k3, (64, 128), jnp.float32) * (1.0 / np.sqrt(128.0)),
        "b2": jax.random.normal(k4, (64,), jnp.float32) * 0.1,
        "w3": jax.random.normal(k5, (1, 64), jnp.float32) * (1.0 / np.sqrt(64.0)),
        "b3": jax.random.normal(k6, (1,), jnp.float32) * 0.1,
    }

    fwd = jax.jit(reward_predictor_forward)

    # Small batch (module-implied input features = 256; batch = 2).
    x = jax.random.normal(kx, (2, 256), jnp.float32)
    out = jax.block_until_ready(fwd(x, params))
    ref = jax.block_until_ready(reference_forward(x, params))
    assert out.shape == (2, 1) and out.dtype == jnp.float32
    assert np.allclose(np.asarray(out), np.asarray(ref), rtol=1e-3, atol=1e-3)

    # Larger batch exercises the batch-tiled grid path (2 grid steps).
    x2 = jax.random.normal(kx2, (512, 256), jnp.float32)
    out2 = jax.block_until_ready(fwd(x2, params))
    ref2 = jax.block_until_ready(reference_forward(x2, params))
    assert out2.shape == (512, 1)
    assert np.allclose(np.asarray(out2), np.asarray(ref2), rtol=1e-3, atol=1e-3)

    print("KERNEL_OK")
</pallas_src>

<mosaic_0001>
module attributes {stable_mosaic.version = 11 : i64} {
  func.func @_reward_predictor_kernel(%arg0: i32, %arg1: memref<2x256xf32, #tpu.memory_space<vmem>>, %arg2: memref<128x256xf32, #tpu.memory_space<vmem>>, %arg3: memref<1x128xf32, #tpu.memory_space<vmem>>, %arg4: memref<64x128xf32, #tpu.memory_space<vmem>>, %arg5: memref<1x64xf32, #tpu.memory_space<vmem>>, %arg6: memref<1x64xf32, #tpu.memory_space<vmem>>, %arg7: memref<1x1xf32, #tpu.memory_space<vmem>>, %arg8: memref<2x1xf32, #tpu.memory_space<vmem>>) attributes {dimension_semantics = [#tpu.dimension_semantics<parallel>], iteration_bounds = array<i64: 1>, scalar_prefetch = 0 : i64, scratch_operands = 0 : i64, tpu.core_type = #tpu.core_type<tc>, window_params = [{transform_indices = @transform_0, window_bounds = array<i64: 2, 256>}, {pipeline_mode = #tpu.pipeline_mode<synchronous>, transform_indices = @transform_1, window_bounds = array<i64: 128, 256>}, {pipeline_mode = #tpu.pipeline_mode<synchronous>, transform_indices = @transform_2, window_bounds = array<i64: 1, 128>}, {pipeline_mode = #tpu.pipeline_mode<synchronous>, transform_indices = @transform_3, window_bounds = array<i64: 64, 128>}, {pipeline_mode = #tpu.pipeline_mode<synchronous>, transform_indices = @transform_4, window_bounds = array<i64: 1, 64>}, {pipeline_mode = #tpu.pipeline_mode<synchronous>, transform_indices = @transform_5, window_bounds = array<i64: 1, 64>}, {pipeline_mode = #tpu.pipeline_mode<synchronous>, transform_indices = @transform_6, window_bounds = array<i64: 1, 1>}, {transform_indices = @transform_7, window_bounds = array<i64: 2, 1>}]} {
    %c0 = arith.constant 0 : index
    %c0_0 = arith.constant 0 : index
    %0 = vector.load %arg1[%c0, %c0_0] : memref<2x256xf32, #tpu.memory_space<vmem>>, vector<2x256xf32>
    %c0_1 = arith.constant 0 : index
    %c0_2 = arith.constant 0 : index
    %1 = vector.load %arg2[%c0_1, %c0_2] : memref<128x256xf32, #tpu.memory_space<vmem>>, vector<128x256xf32>
    %cst = arith.constant dense<0.000000e+00> : vector<2x128xf32>
    %2 = tpu.matmul %0, %1, %cst {dimension_numbers = #tpu.dot_dimension_numbers<[1], [1], [0], [0], [0, 0, 1, 0], [], []>} : vector<2x256xf32>, vector<128x256xf32>, vector<2x128xf32> -> vector<2x128xf32>
    %c0_3 = arith.constant 0 : index
    %c0_4 = arith.constant 0 : index
    %3 = vector.load %arg3[%c0_3, %c0_4] : memref<1x128xf32, #tpu.memory_space<vmem>>, vector<1x128xf32>
    %4 = vector.broadcast %3 : vector<1x128xf32> to vector<2x128xf32>
    %5 = arith.addf %2, %4 : vector<2x128xf32>
    %cst_5 = arith.constant 0.000000e+00 : f32
    %6 = vector.broadcast %cst_5 : f32 to vector<2x128xf32>
    %7 = arith.maximumf %5, %6 : vector<2x128xf32>
    %c0_6 = arith.constant 0 : index
    %c0_7 = arith.constant 0 : index
    %8 = vector.load %arg4[%c0_6, %c0_7] : memref<64x128xf32, #tpu.memory_space<vmem>>, vector<64x128xf32>
    %cst_8 = arith.constant dense<0.000000e+00> : vector<2x64xf32>
    %9 = tpu.matmul %7, %8, %cst_8 {dimension_numbers = #tpu.dot_dimension_numbers<[1], [1], [0], [0], [0, 0, 1, 0], [], []>} : vector<2x128xf32>, vector<64x128xf32>, vector<2x64xf32> -> vector<2x64xf32>
    %c0_9 = arith.constant 0 : index
    %c0_10 = arith.constant 0 : index
    %10 = vector.load %arg5[%c0_9, %c0_10] : memref<1x64xf32, #tpu.memory_space<vmem>>, vector<1x64xf32>
    %11 = vector.broadcast %10 : vector<1x64xf32> to vector<2x64xf32>
    %12 = arith.addf %9, %11 : vector<2x64xf32>
    %cst_11 = arith.constant 0.000000e+00 : f32
    %13 = vector.broadcast %cst_11 : f32 to vector<2x64xf32>
    %14 = arith.maximumf %12, %13 : vector<2x64xf32>
    %c0_12 = arith.constant 0 : index
    %c0_13 = arith.constant 0 : index
    %15 = vector.load %arg6[%c0_12, %c0_13] : memref<1x64xf32, #tpu.memory_space<vmem>>, vector<1x64xf32>
    %16 = vector.broadcast %15 : vector<1x64xf32> to vector<2x64xf32>
    %17 = arith.mulf %14, %16 : vector<2x64xf32>
    %cst_14 = arith.constant dense<0.000000e+00> : vector<2xf32>
    %18 = vector.multi_reduction <add>, %17, %cst_14 [1] : vector<2x64xf32> to vector<2xf32>
    %19 = vector.shape_cast %18 : vector<2xf32> to vector<2x1xf32>
    %c0_15 = arith.constant 0 : index
    %c0_16 = arith.constant 0 : index
    %20 = vector.load %arg7[%c0_15, %c0_16] : memref<1x1xf32, #tpu.memory_space<vmem>>, vector<1x1xf32>
    %21 = vector.broadcast %20 : vector<1x1xf32> to vector<2x1xf32>
    %22 = arith.addf %19, %21 : vector<2x1xf32>
    %c0_17 = arith.constant 0 : index
    %c0_18 = arith.constant 0 : index
    %23 = vector.load %arg8[%c0_17, %c0_18] : memref<2x1xf32, #tpu.memory_space<vmem>>, vector<2x1xf32>
    tpu.vector_store %arg8[%c0_17, %c0_18], %22 {strides = array<i32>} : memref<2x1xf32, #tpu.memory_space<vmem>>, vector<2x1xf32>,
    return
  }
  func.func @transform_0(%arg0: i32) -> (i32, i32) {
    %c0_i32 = arith.constant 0 : i32
    %c0_i32_0 = arith.constant 0 : i32
    return %arg0, %c0_i32 : i32, i32
  }
  func.func @transform_1(%arg0: i32) -> (i32, i32) {
    %c0_i32 = arith.constant 0 : i32
    %c0_i32_0 = arith.constant 0 : i32
    %c0_i32_1 = arith.constant 0 : i32
    return %c0_i32, %c0_i32_0 : i32, i32
  }
  func.func @transform_2(%arg0: i32) -> (i32, i32) {
    %c0_i32 = arith.constant 0 : i32
    %c0_i32_0 = arith.constant 0 : i32
    %c0_i32_1 = arith.constant 0 : i32
    return %c0_i32, %c0_i32_0 : i32, i32
  }
  func.func @transform_3(%arg0: i32) -> (i32, i32) {
    %c0_i32 = arith.constant 0 : i32
    %c0_i32_0 = arith.constant 0 : i32
    %c0_i32_1 = arith.constant 0 : i32
    return %c0_i32, %c0_i32_0 : i32, i32
  }
  func.func @transform_4(%arg0: i32) -> (i32, i32) {
    %c0_i32 = arith.constant 0 : i32
    %c0_i32_0 = arith.constant 0 : i32
    %c0_i32_1 = arith.constant 0 : i32
    return %c0_i32, %c0_i32_0 : i32, i32
  }
  func.func @transform_5(%arg0: i32) -> (i32, i32) {
    %c0_i32 = arith.constant 0 : i32
    %c0_i32_0 = arith.constant 0 : i32
    %c0_i32_1 = arith.constant 0 : i32
    return %c0_i32, %c0_i32_0 : i32, i32
  }
  func.func @transform_6(%arg0: i32) -> (i32, i32) {
    %c0_i32 = arith.constant 0 : i32
    %c0_i32_0 = arith.constant 0 : i32
    %c0_i32_1 = arith.constant 0 : i32
    return %c0_i32, %c0_i32_0 : i32, i32
  }
  func.func @transform_7(%arg0: i32) -> (i32, i32) {
    %c0_i32 = arith.constant 0 : i32
    %c0_i32_0 = arith.constant 0 : i32
    return %arg0, %c0_i32 : i32, i32
  }
}

</mosaic_0001>

<bundles_post_ra>
// kernel: reward_predictor_forward.1
= control target key start
LH: loop header
LB: loop body
LE: loop exit
PB: predicated region body
PF: predicated region fallthrough
CT: control target
= control target key end

     0   :  { %s463_s0 = inlined_call_operand.vmem [shape: f32[2,256], index: 0, kind: input, shape index: {}]   ;;  %s464_s1 = inlined_call_operand.hbm [shape: f32[128,256], index: 1, kind: input, shape index: {}]   ;;  %s465_s2 = inlined_call_operand.vmem [shape: f32[1,128], index: 2, kind: input, shape index: {}]   ;;  %s466_s3 = inlined_call_operand.hbm [shape: f32[64,128], index: 3, kind: input, shape index: {}]   ;;  %s467_s4 = inlined_call_operand.vmem [shape: f32[1,64], index: 4, kind: input, shape index: {}]   ;;  %s468_s5 = inlined_call_operand.vmem [shape: f32[1,64], index: 5, kind: input, shape index: {}]   ;;  %s469_s6 = inlined_call_operand.<no memory space> [shape: f32[1,1], index: 6, kind: input, shape index: {}]   ;;  %s470_s7 = inlined_call_operand.vmem [shape: f32[2,1], index: 7, kind: output, shape index: {}]  }
   0x1   :  { %v12_v0 = vstv %s469_s6 }
   0x2   :  { %13 = vst [vmem:[#allocation2] sm:$0x1] %v12_v0 }
   0x3   :  { %14 = vsyncpa [#allocation4], 0 }
   0x4   :  { %15 = vsyncpa [#allocation6], 0  ;;  %s377_s26 = smov [#allocation3]  }
   0x5   :  { %s23_s27 = sshll.u32 %s377_s26, 4  ;;  %s24_s27 = int_to_ptr.vmem [resolvable:$true] %s23_s27 }
   0x6   :  { %s341_s28 = scalar_lea.vmem %s24_s27, 4096  ;;  %p346_p1 = scmp.lt.s32.totalorder %s24_s27, %s24_s27 }
   0x7   :  { %p342_p0 = scmp.ne.s32.totalorder %s24_s27, %s341_s28  ;;  %p347_p2 = scmp.lt.s32.totalorder %s341_s28, %s341_s28 }
   0x9   :  { %p348_p3 = por %p347_p2, %p346_p1 }
   0xb   :  { %p349_p4 = pnand %p348_p3, %p342_p0 }
   0xd   :  { %352 = shalt.err (!%p349_p4)
}
   0xe   :  { %s378_s29 = smov 256   ;;  %s379_s30 = smov 16  }
   0xf   :  { %29 = dma.hbm_to_vmem [thread:$0]  %s464_s1, 4096, %s24_s27, [#allocation4], %s378_s29, %s378_s29, %s379_s30  }
  0x10   :  { %s380_s6 = smov [#allocation5]  }
  0x11   :  { %s37_s10 = sshll.u32 %s380_s6, 4  ;;  %s38_s10 = int_to_ptr.vmem [resolvable:$true] %s37_s10 }
  0x12   :  { %s361_s11 = scalar_lea.vmem %s38_s10, 1024  ;;  %p366_p6 = scmp.lt.s32.totalorder %s38_s10, %s38_s10 }
  0x13   :  { %p362_p5 = scmp.ne.s32.totalorder %s38_s10, %s361_s11  ;;  %p367_p7 = scmp.lt.s32.totalorder %s361_s11, %s361_s11 }
  0x15   :  { %p368_p8 = por %p367_p7, %p366_p6 }
  0x17   :  { %p369_p9 = pnand %p368_p8, %p362_p5 }
  0x19   :  { %372 = shalt.err (!%p369_p9)
}
  0x1a   :  { %s381_s12 = smov 128   ;;  %s382_s13 = smov 8  }
  0x1b   :  { %43 = dma.hbm_to_vmem [thread:$0]  %s466_s3, 1024, %s38_s10, [#allocation6], %s381_s12, %s381_s12, %s382_s13  }
  0x1c   :  { %373 = dma.done.wait [#allocation4], 4096  }
  0x1d   :  { %374 = vsyncadd [#allocation4], 4294963200 }
  0x1e   :  { %375 = dma.done.wait [#allocation6], 1024  }
  0x1f   :  { %376 = vsyncadd [#allocation6], 4294966272  ;;  %v383_v1 = vmov 0.0   ;;  %v88_v2 = vld [vmem:[#allocation3 + $0xf8] sm:$0xff]  ;;  %v87_v3 = vld [vmem:[#allocation3 + $0xf0] sm:$0xff]  ;;  %vm384_vm0 = vmmov 0  }
  0x20   :  { %306 = vmatprep.subr.mxu1 %v383_v1  ;;  %v86_v4 = vld [vmem:[#allocation3 + $0xe8] sm:$0xff]  ;;  %107 = vmatprep.subr.mxu0 %v88_v2  ;;  %v85_v5 = vld [vmem:[#allocation3 + $0xe0] sm:$0xff]  ;;  %v84_v6 = vld [vmem:[#allocation3 + $0xd8] sm:$0xff]  ;;  %vm272_vm1 = vcmask 517120   ;;  %vm284_vm2 = vcmask 1024  }
  0x21   :  { %108 = vmatpush1.xpose.msra.mxu0 %v87_v3  ;;  %v83_v7 = vld [vmem:[#allocation3 + $0xd0] sm:$0xff]  ;;  %v82_v8 = vld [vmem:[#allocation3 + $0xc8] sm:$0xff]  ;;  %v438_v9 = vld.sshfl [vmem:[%s463_s0] sm:$0x33 pattern:$0x76325410]  ;;  %322 = vmatprep.mubr.msk.f32.mxu1 %vm384_vm0, %v383_v1 }
  0x22   :  { %109 = vmatprep.subr.mxu0 %v86_v4  ;;  %v81_v10 = vld [vmem:[#allocation3 + $0xc0] sm:$0xff]  ;;  %v104_v11 = vcombine.high %v438_v9, %v438_v9  ;;  %v185_v12 = vld [vmem:[#allocation5 + $0x38] sm:$0xff]  ;;  %v184_v14 = vld [vmem:[#allocation5 + $0x30] sm:$0xff] }
  0x23   :  { %v80_v13 = vld [vmem:[#allocation3 + $0xb8] sm:$0xff]  ;;  %307 = vmatpush3.xpose.msra.mxu1 %v185_v12  ;;  %v79_v15 = vld [vmem:[#allocation3 + $0xb0] sm:$0xff]  ;;  %v78_v16 = vld [vmem:[#allocation3 + $0xa8] sm:$0xff] }
  0x24   :  { %171 = vmatprep.mubr.f32.mxu0 %v104_v11  ;;  %308 = vmatprep.subr.mxu1 %v383_v1  ;;  %v183_v17 = vld [vmem:[#allocation5 + $0x28] sm:$0xff]  ;;  %v77_v18 = vld [vmem:[#allocation3 + $0xa0] sm:$0xff]  ;;  %v76_v19 = vld [vmem:[#allocation3 + $0x98] sm:$0xff] }
  0x25   :  { %110 = vmatpush1.xpose.msra.mxu0 %v85_v5  ;;  %v182_v20 = vld [vmem:[#allocation5 + $0x20] sm:$0xff]  ;;  %v75_v21 = vld [vmem:[#allocation3 + $0x90] sm:$0xff]  ;;  %v74_v22 = vld [vmem:[#allocation3 + $0x88] sm:$0xff] }
  0x26   :  { %111 = vmatprep.subr.mxu0 %v84_v6  ;;  %v181_v23 = vld [vmem:[#allocation5 + $0x18] sm:$0xff]  ;;  %v73_v24 = vld [vmem:[#allocation3 + $0x80] sm:$0xff]  ;;  %v180_v26 = vld [vmem:[#allocation5 + $0x10] sm:$0xff] }
  0x27   :  { %309 = vmatpush3.xpose.msra.mxu1 %v184_v14  ;;  %v72_v25 = vld [vmem:[#allocation3 + $0x78] sm:$0xff]  ;;  %v71_v27 = vld [vmem:[#allocation3 + $0x70] sm:$0xff]  ;;  %v70_v28 = vld [vmem:[#allocation3 + $0x68] sm:$0xff] }
  0x28   :  { %310 = vmatprep.subr.mxu1 %v383_v1  ;;  %v179_v29 = vld [vmem:[#allocation5 + $0x8] sm:$0xff]  ;;  %v69_v30 = vld [vmem:[#allocation3 + $0x60] sm:$0xff]  ;;  %v68_v31 = vld [vmem:[#allocation3 + $0x58] sm:$0xff] }
  0x29   :  { %112 = vmatpush1.xpose.msra.mxu0 %v83_v7  ;;  %v67_v32 = vld [vmem:[#allocation3 + $0x50] sm:$0xff]  ;;  %v66_v33 = vld [vmem:[#allocation3 + $0x48] sm:$0xff]  ;;  %v65_v34 = vld [vmem:[#allocation3 + $0x40] sm:$0xff] }
  0x2a   :  { %113 = vmatprep.subr.mxu0 %v82_v8  ;;  %v64_v35 = vld [vmem:[#allocation3 + $0x38] sm:$0xff]  ;;  %v63_v36 = vld [vmem:[#allocation3 + $0x30] sm:$0xff]  ;;  %v62_v37 = vld [vmem:[#allocation3 + $0x28] sm:$0xff] }
  0x2b   :  { %311 = vmatpush3.xpose.msra.mxu1 %v183_v17  ;;  %v61_v38 = vld [vmem:[#allocation3 + $0x20] sm:$0xff]  ;;  %v60_v39 = vld [vmem:[#allocation3 + $0x18] sm:$0xff]  ;;  %v59_v40 = vld [vmem:[#allocation3 + $0x10] sm:$0xff] }
  0x2c   :  { %312 = vmatprep.subr.mxu1 %v383_v1  ;;  %v58_v41 = vld [vmem:[#allocation3 + $0x8] sm:$0xff]  ;;  %v57_v42 = vld [vmem:[#allocation3] sm:$0xff]  ;;  %v292_v44 = vld [vmem:[%s465_s2] ss:$0 sm:$0xff] }
  0x2d   :  { %114 = vmatpush1.xpose.msra.mxu0 %v81_v10  ;;  %v178_v43 = vld [vmem:[#allocation5] sm:$0xff]  ;;  %v294_v49 = vld [vmem:[%s467_s4] ss:$0 sm:$0xff] }
  0x2e   :  { %115 = vmatprep.subr.mxu0 %v80_v13  ;;  %v295_v53 = vld [vmem:[%s468_s5] ss:$0 sm:$0xff] }
  0x2f   :  { %313 = vmatpush3.xpose.msra.mxu1 %v182_v20  ;;  %v296_v57 = vld [vmem:[#allocation2] ss:$0 sm:$0xff] }
  0x30   :  { %314 = vmatprep.subr.mxu1 %v383_v1 }
  0x31   :  { %116 = vmatpush1.xpose.msra.mxu0 %v79_v15 }
  0x32   :  { %117 = vmatprep.subr.mxu0 %v78_v16 }
  0x33   :  { %315 = vmatpush3.xpose.msra.mxu1 %v181_v23 }
  0x34   :  { %316 = vmatprep.subr.mxu1 %v383_v1 }
  0x35   :  { %118 = vmatpush1.xpose.msra.mxu0 %v77_v18 }
  0x36   :  { %119 = vmatprep.subr.mxu0 %v76_v19 }
  0x37   :  { %317 = vmatpush3.xpose.msra.mxu1 %v180_v26 }
  0x38   :  { %318 = vmatprep.subr.mxu1 %v383_v1 }
  0x39   :  { %120 = vmatpush1.xpose.msra.mxu0 %v75_v21 }
  0x3a   :  { %121 = vmatprep.subr.mxu0 %v74_v22 }
  0x3b   :  { %319 = vmatpush3.xpose.msra.mxu1 %v179_v29 }
  0x3c   :  { %320 = vmatprep.subr.mxu1 %v383_v1 }
  0x3d   :  { %122 = vmatpush1.xpose.msra.mxu0 %v73_v24 }
  0x3e   :  { %123 = vmatprep.subr.mxu0 %v72_v25 }
  0x3f   :  { %321 = vmatpush3.xpose.msra.mxu1 %v178_v43 }
  0x41   :  { %124 = vmatpush1.xpose.msra.mxu0 %v71_v27 }
  0x42   :  { %125 = vmatprep.subr.mxu0 %v70_v28 }
  0x45   :  { %126 = vmatpush1.xpose.msra.mxu0 %v69_v30 }
  0x46   :  { %127 = vmatprep.subr.mxu0 %v68_v31 }
  0x49   :  { %128 = vmatpush1.xpose.msra.mxu0 %v67_v32 }
  0x4a   :  { %129 = vmatprep.subr.mxu0 %v66_v33 }
  0x4d   :  { %130 = vmatpush1.xpose.msra.mxu0 %v65_v34 }
  0x4e   :  { %131 = vmatprep.subr.mxu0 %v64_v35 }
  0x51   :  { %132 = vmatpush1.xpose.msra.mxu0 %v63_v36 }
  0x52   :  { %133 = vmatprep.subr.mxu0 %v62_v37 }
  0x55   :  { %134 = vmatpush1.xpose.msra.mxu0 %v61_v38 }
  0x56   :  { %135 = vmatprep.subr.mxu0 %v60_v39 }
  0x59   :  { %136 = vmatpush1.xpose.msra.mxu0 %v59_v40 }
  0x5a   :  { %137 = vmatprep.subr.mxu0 %v58_v41 }
  0x5d   :  { %138 = vmatpush1.xpose.msra.mxu0 %v57_v42 }
  0x60   :  { %172 = vmatmul.mubr.f32.vlgmr.msra.gmra.mxu0 %v438_v9 }
 0x120   :  { %v173_v45 = vpop.f32.mrf.mxu0 }
 0x121   :  { %v174_v46 = vadd.f32 %v292_v44, %v173_v45 }
 0x122   :  { %v175_v47 = vpop.f32.mrf.mxu0 }
 0x123   :  { %v177_v48 = vmax.f32 %v174_v46, 0.0 }
 0x125   :  { %323 = vmatmul.mubr.f32.vlgmr.msra.gmra.mxu1 %v177_v48 }
 0x1e5   :  { %v259_v50 = vpop.f32.mrf.mxu1 }
 0x1e6   :  { %v260_v51 = vadd.f32 %v294_v49, %v259_v50 }
 0x1e7   :  { %v324_v52 = vpop.f32.mrf.mxu1 }
 0x1e8   :  { %v263_v54 = vmax.f32 %v260_v51, 0.0 }
 0x1ea   :  { %v271_v55 = vmul.f32 %v295_v53, %v263_v54 }
 0x1ec   :  { %v273_v56 = vsel %vm272_vm1, %v271_v55, 0.0 }
 0x1ed   :  { %274 = vadd.xlane.f32.xlu0 %v273_v56 }
 0x276   :  { %v275_v58 = vpop.xlane.xlu0 %274 }
 0x277   :  { %v283_v59 = vadd.f32 %v296_v57, %v275_v58 }
 0x279   :  { %285 = vst.msk [vmem:[%s470_s7] sm:$0x3] %vm284_vm2, %v283_v59 }
 0x27a   :  { %290 = vsyncpa [#allocation4], 1 }
 0x27b   :  { %291 = vsyncpa [#allocation6], 1 }

</bundles_post_ra>
